<compile_context>
chip_gen: v6e
topology: v6e:2x2x1
jax: 0.10.0
libtpu: 0.0.40
codegen_flags: <defaults>
</compile_context>

<pallas_src>
from functools import partial

import jax
import jax.numpy as jnp
from jax import lax
from jax.experimental import pallas as pl
from jax.experimental.pallas import tpu as pltpu

EPS = 1e-5
SSN_S = 5  # SubSpectralNorm sub-band count


# ----------------------------- Pallas kernel --------------------------------

def make_bcres_kernel(transition: bool, dilation: int, H: int, W: int,
                      fast: bool):
    """Fused BCResBlock kernel; one batch element per grid step.

    Per-step working layout (channel-major, lane-dense):
      x, aux, out : (C, H*W)   flat index f = h*W + w   (H*W % 128 == 0)
      pooled path : (C, W)
    """
    HW = H * W
    d = dilation
    cdtype = jnp.bfloat16 if fast else jnp.float32

    def kernel(*refs):
        if transition:
            (x_ref, pw0_ref, bn0_ref, dw1_ref, ssn_s_ref, ssn_b_ref,
             wpos_ref, dw2_ref, bn2_ref, pw1_ref, o_ref) = refs
        else:
            (x_ref, dw1_ref, ssn_s_ref, ssn_b_ref,
             wpos_ref, dw2_ref, bn2_ref, pw1_ref, o_ref) = refs

        x = x_ref[...]                                  # (C_in, HW), cdtype

        # --- optional transition: 1x1 conv (BN folded) + ReLU --> MXU --------
        if transition:
            acc = jnp.dot(pw0_ref[...], x,
                          preferred_element_type=jnp.float32)     # (C, HW) f32
            xw = jnp.maximum(acc + bn0_ref[...], 0.0)
        else:
            xw = x.astype(jnp.float32)                  # elementwise path in f32

        C = xw.shape[0]

        # --- f2: depthwise (3,1) conv along H, pad (1,0) ----------------------
        # An H-shift is a lane shift by +-W on the flat (h,w) axis (128-aligned
        # here). pltpu.roll runs on the XLU; wrapped rows at the h=0 / h=H-1
        # edges are zeroed with iota-compare masks (no DMA'd mask operands).
        f_pos = lax.broadcasted_iota(jnp.int32, (1, HW), 1)
        dw1 = dw1_ref[...]                              # (C, 3)
        x_dn = jnp.where(f_pos >= W,
                         pltpu.roll(xw, shift=W, axis=1), 0.0)        # x[h-1]
        x_up = jnp.where(f_pos < HW - W,
                         pltpu.roll(xw, shift=HW - W, axis=1), 0.0)   # x[h+1]
        y2 = dw1[:, 0:1] * x_dn + dw1[:, 1:2] * xw + dw1[:, 2:3] * x_up

        # SubSpectralNorm: per-(channel, sub-band) affine (folded, precomputed).
        y2 = y2 * ssn_s_ref[...] + ssn_b_ref[...]       # (C, HW) f32
        aux = y2

        # --- frequency pool (AdaptiveAvgPool2d((1, None))) --------------------
        # H-SUM as a transposed MXU contraction against an in-kernel 0/1
        # one-hot: onehot[w, f] = (f mod W == w).  The 1/H of the mean is
        # folded into dw2_eff, so bf16 0/1 operands stay exact.
        row_w = lax.broadcasted_iota(jnp.int32, (W, HW), 0)
        onehot = (wpos_ref[...] == row_w).astype(cdtype)           # (W, HW)
        pm = lax.dot_general(y2.astype(cdtype), onehot,
                             (((1,), (1,)), ((), ())),
                             preferred_element_type=jnp.float32)   # (C, W)

        # --- f1: depthwise (1,3) dilated conv along W, BN folded, SiLU --------
        # pm is a single (C, W) vreg; zero-padded slice shifts are one cheap
        # copy each (roll would need an unaligned sub-128-lane rotate here for
        # no measurable gain).  No wmask needed: the zero fill IS the padding.
        dw2 = dw2_ref[...]                              # (C, 3), BN + 1/H folded
        zc = jnp.zeros((C, d), jnp.float32)
        p_l = jnp.concatenate([zc, pm[:, :W - d]], axis=1)          # pm[w-d]
        p_r = jnp.concatenate([pm[:, d:], zc], axis=1)              # pm[w+d]
        z = (dw2[:, 0:1] * p_l + dw2[:, 1:2] * pm + dw2[:, 2:3] * p_r
             + bn2_ref[...])
        den = 1.0 + jnp.exp(-z)
        inv = pl.reciprocal(den, approx=True) if fast else pl.reciprocal(den)
        z = z * inv                                     # SiLU

        # --- final 1x1 conv: MXU matmul, then broadcast back over H (MXU) -----
        out1 = jnp.dot(pw1_ref[...], z.astype(cdtype),
                       preferred_element_type=jnp.float32)          # (C, W)
        # Dropout2d(0.1): identity in eval mode.
        out1_b = jnp.dot(out1.astype(cdtype), onehot,
                         preferred_element_type=jnp.float32)        # (C, HW)

        # --- residual adds + ReLU, lane-dense store ----------------------------
        out = out1_b + aux
        if not transition:
            out = out + xw                              # identity shortcut
        o_ref[...] = jnp.maximum(out, 0.0).astype(o_ref.dtype)

    return kernel


@partial(jax.jit, static_argnames=("idx", "transition", "fast"))
def bcres_block(x, params, idx, transition, fast=False):
    """Run the fused BCResBlock Pallas kernel on x: (N, C_in, H, W) NCHW."""
    N, C_in, H, W = x.shape
    C_out = params["pw1"].shape[0]
    HW = H * W
    assert H % SSN_S == 0, "SubSpectralNorm requires H divisible by 5"
    d = 2 ** idx
    assert 0 < d < W, "dilation must be smaller than the time axis"
    # Lane alignment for the rolls / unmasked stores (see TODO at top for the
    # padded / W-tiled path at general sizes).
    assert HW % 128 == 0, "pad the time axis so H*W is a multiple of 128"

    cdtype = jnp.bfloat16 if fast else jnp.float32
    # NCHW -> per-batch channel-major (C, H*W) slabs; reshape is a free view.
    x3 = x.reshape(N, C_in, HW).astype(cdtype)

    in_arrays = [x3]
    in_specs = [pl.BlockSpec((None, C_in, HW), lambda n: (n, 0, 0))]
    if transition:
        in_arrays += [params["pw0_eff"].astype(cdtype), params["bn0_shift"]]
    in_arrays += [params["dw1"], params["ssn_scale_map"], params["ssn_shift_map"],
                  params["wpos"], params["dw2_eff"], params["bn2_shift"],
                  params["pw1"].astype(cdtype)]
    # Constant operands: full blocks with a fixed block index -> DMA'd once,
    # resident in VMEM across all batch steps (no per-step re-DMA).
    for a in in_arrays[1:]:
        in_specs.append(pl.BlockSpec(a.shape, lambda n, _nd=a.ndim: (0,) * _nd))

    kernel = make_bcres_kernel(transition, d, H, W, fast)
    fn = pl.pallas_call(
        kernel,
        out_shape=jax.ShapeDtypeStruct((N, C_out, HW), jnp.float32),
        grid_spec=pltpu.PrefetchScalarGridSpec(
            num_scalar_prefetch=0,
            grid=(N,),                       # one batch element per step
            in_specs=in_specs,
            out_specs=pl.BlockSpec((None, C_out, HW), lambda n: (n, 0, 0)),
        ),
        compiler_params=pltpu.CompilerParams(
            # Batch steps are independent -> shards across both TensorCores on
            # v7x; neutral on single-TC v5e/v6e.
            dimension_semantics=("parallel",)),
    )
    out = fn(*in_arrays)
    return out.reshape(N, C_out, H, W)


# --------------------------- parameters (glue) -------------------------------

def init_raw_params(key, C_in, C_out, S=SSN_S):
    transition = C_in != C_out
    keys = iter(jax.random.split(key, 32))

    def u(shape, lo=-0.5, hi=0.5):
        return jax.random.uniform(next(keys), shape, jnp.float32, lo, hi)

    def upos(shape):
        return jax.random.uniform(next(keys), shape, jnp.float32, 0.7, 1.3)

    raw = {}
    if transition:
        raw["pw0"] = u((C_out, C_in))
        raw["bn0_gamma"] = upos((C_out,)); raw["bn0_beta"] = u((C_out,))
        raw["bn0_mean"] = u((C_out,));     raw["bn0_var"] = upos((C_out,))
    raw["dw1"] = u((C_out, 3))                      # depthwise (3,1) taps
    raw["ssn_gamma"] = upos((C_out * S,)); raw["ssn_beta"] = u((C_out * S,))
    raw["ssn_mean"] = u((C_out * S,));     raw["ssn_var"] = upos((C_out * S,))
    raw["dw2"] = u((C_out, 3))                      # depthwise (1,3) taps
    raw["bn2_gamma"] = upos((C_out,)); raw["bn2_beta"] = u((C_out,))
    raw["bn2_mean"] = u((C_out,));     raw["bn2_var"] = upos((C_out,))
    raw["pw1"] = u((C_out, C_out))                  # final 1x1 conv
    return raw


def fold_params(raw, H, W, transition, S=SSN_S, eps=EPS):
    """Fold BN/SSN running stats and build ALL constant operands once
    (hoisted off the per-forward path)."""
    p = {}
    if transition:
        s0 = raw["bn0_gamma"] / jnp.sqrt(raw["bn0_var"] + eps)
        p["pw0_eff"] = raw["pw0"] * s0[:, None]
        p["bn0_shift"] = (raw["bn0_beta"] - raw["bn0_mean"] * s0)[:, None]
    p["dw1"] = raw["dw1"]
    C_out = raw["dw1"].shape[0]
    ss = raw["ssn_gamma"] / jnp.sqrt(raw["ssn_var"] + eps)
    st = raw["ssn_beta"] - raw["ssn_mean"] * ss
    scale_ch = jnp.repeat(ss.reshape(C_out, S), H // S, axis=1)       # (C, H)
    shift_ch = jnp.repeat(st.reshape(C_out, S), H // S, axis=1)
    p["ssn_scale_map"] = jnp.repeat(scale_ch, W, axis=1)              # (C, H*W)
    p["ssn_shift_map"] = jnp.repeat(shift_ch, W, axis=1)
    s2 = raw["bn2_gamma"] / jnp.sqrt(raw["bn2_var"] + eps)
    # Fold BN scale AND the 1/H of the frequency mean-pool into the taps (the
    # kernel pools with an H-sum); bn2_shift is applied after the taps.
    p["dw2_eff"] = raw["dw2"] * (s2 / H)[:, None]
    p["bn2_shift"] = (raw["bn2_beta"] - raw["bn2_mean"] * s2)[:, None]
    p["pw1"] = raw["pw1"]
    # w-position of every flat (h,w) index; tiny int32 operand so the kernel
    # builds the pooling one-hot from a compare (no vector modulo in-kernel).
    p["wpos"] = (jnp.arange(H * W, dtype=jnp.int32) % W).reshape(1, H * W)
    return p


# ---------------------- pure-JAX reference (for checking) --------------------

def ref_forward(x, raw, idx, transition, S=SSN_S, eps=EPS):
    dn = ("NCHW", "OIHW", "NCHW")

    def bn_fold(g, b, m, v):
        s = g / jnp.sqrt(v + eps)
        return s, b - m * s

    h = x
    if transition:
        h = lax.conv_general_dilated(h, raw["pw0"][:, :, None, None],
                                     (1, 1), ((0, 0), (0, 0)),
                                     dimension_numbers=dn)
        s, t = bn_fold(raw["bn0_gamma"], raw["bn0_beta"],
                       raw["bn0_mean"], raw["bn0_var"])
        h = jnp.maximum(h * s[None, :, None, None] + t[None, :, None, None], 0.0)
    C = h.shape[1]
    y2 = lax.conv_general_dilated(h, raw["dw1"][:, None, :, None],
                                  (1, 1), ((1, 1), (0, 0)),
                                  dimension_numbers=dn, feature_group_count=C)
    N, _, H, W = y2.shape
    s, t = bn_fold(raw["ssn_gamma"], raw["ssn_beta"],
                   raw["ssn_mean"], raw["ssn_var"])
    y2r = y2.reshape(N, C * S, H // S, W)
    y2r = y2r * s[None, :, None, None] + t[None, :, None, None]
    y2 = y2r.reshape(N, C, H, W)
    pm = jnp.mean(y2, axis=2, keepdims=True)
    d = 2 ** idx
    z = lax.conv_general_dilated(pm, raw["dw2"][:, None, None, :],
                                 (1, 1), ((0, 0), (d, d)), rhs_dilation=(1, d),
                                 dimension_numbers=dn, feature_group_count=C)
    s, t = bn_fold(raw["bn2_gamma"], raw["bn2_beta"],
                   raw["bn2_mean"], raw["bn2_var"])
    z = z * s[None, :, None, None] + t[None, :, None, None]
    z = z * (1.0 / (1.0 + jnp.exp(-z)))
    z = lax.conv_general_dilated(z, raw["pw1"][:, :, None, None],
                                 (1, 1), ((0, 0), (0, 0)), dimension_numbers=dn)
    out = z + y2
    if not transition:
        out = out + x
    return jnp.maximum(out, 0.0)


# ----------------------------------- main ------------------------------------

if __name__ == "__main__":
    # H divisible by 5 (SSN sub-bands); H*W = 640 = 5*128 lane-aligned slabs.
    N, H, W, idx = 2, 20, 32, 1
    base_key = jax.random.PRNGKey(0)

    for C_in, C_out, name in [(8, 8, "identity"), (4, 8, "transition")]:
        kx, kp = jax.random.split(jax.random.fold_in(base_key, C_in))
        x = jax.random.normal(kx, (N, C_in, H, W), jnp.float32)
        transition = C_in != C_out
        raw = init_raw_params(kp, C_in, C_out)
        params = fold_params(raw, H, W, transition)
        ref = ref_forward(x, raw, idx, transition)

        # f32 MXU path: tight check.
        out = jax.block_until_ready(
            bcres_block(x, params, idx=idx, transition=transition, fast=False))
        assert out.shape == (N, C_out, H, W)
        err = float(jnp.max(jnp.abs(out - ref)))
        assert err < 1e-3, f"{name} (f32): max abs err {err}"

        # bf16-MXU-operand + approx-reciprocal path (v6e/v7x throughput mode):
        # looser tolerance — error is bounded by bf16 rounding of matmul
        # operands and in-kernel casts; accumulation stays f32.
        out_f = jax.block_until_ready(
            bcres_block(x, params, idx=idx, transition=transition, fast=True))
        err_f = float(jnp.max(jnp.abs(out_f - ref)))
        assert err_f < 1e-1, f"{name} (bf16 fast): max abs err {err_f}"

    print("KERNEL_OK")
</pallas_src>

<mosaic_0001>
module attributes {stable_mosaic.version = 11 : i64} {
  func.func @kernel(%arg0: i32, %arg1: memref<1x8x640xf32, #tpu.memory_space<vmem>>, %arg2: memref<8x3xf32, #tpu.memory_space<vmem>>, %arg3: memref<8x640xf32, #tpu.memory_space<vmem>>, %arg4: memref<8x640xf32, #tpu.memory_space<vmem>>, %arg5: memref<1x640xi32, #tpu.memory_space<vmem>>, %arg6: memref<8x3xf32, #tpu.memory_space<vmem>>, %arg7: memref<8x1xf32, #tpu.memory_space<vmem>>, %arg8: memref<8x8xf32, #tpu.memory_space<vmem>>, %arg9: memref<1x8x640xf32, #tpu.memory_space<vmem>>) attributes {dimension_semantics = [#tpu.dimension_semantics<parallel>], iteration_bounds = array<i64: 2>, scalar_prefetch = 0 : i64, scratch_operands = 0 : i64, tpu.core_type = #tpu.core_type<tc>, window_params = [{transform_indices = @transform_0, window_bounds = array<i64: 1, 8, 640>}, {pipeline_mode = #tpu.pipeline_mode<synchronous>, transform_indices = @transform_1, window_bounds = array<i64: 8, 3>}, {pipeline_mode = #tpu.pipeline_mode<synchronous>, transform_indices = @transform_2, window_bounds = array<i64: 8, 640>}, {pipeline_mode = #tpu.pipeline_mode<synchronous>, transform_indices = @transform_3, window_bounds = array<i64: 8, 640>}, {pipeline_mode = #tpu.pipeline_mode<synchronous>, transform_indices = @transform_4, window_bounds = array<i64: 1, 640>}, {pipeline_mode = #tpu.pipeline_mode<synchronous>, transform_indices = @transform_5, window_bounds = array<i64: 8, 3>}, {pipeline_mode = #tpu.pipeline_mode<synchronous>, transform_indices = @transform_6, window_bounds = array<i64: 8, 1>}, {pipeline_mode = #tpu.pipeline_mode<synchronous>, transform_indices = @transform_7, window_bounds = array<i64: 8, 8>}, {transform_indices = @transform_8, window_bounds = array<i64: 1, 8, 640>}]} {
    %c0 = arith.constant 0 : index
    %c0_0 = arith.constant 0 : index
    %c0_1 = arith.constant 0 : index
    %0 = vector.load %arg1[%c0, %c0_0, %c0_1] : memref<1x8x640xf32, #tpu.memory_space<vmem>>, vector<1x8x640xf32>
    %1 = vector.shape_cast %0 : vector<1x8x640xf32> to vector<8x640xf32>
    %2 = tpu.iota {dimensions = array<i32: 1>} : vector<1x640xi32>
    %c0_2 = arith.constant 0 : index
    %c0_3 = arith.constant 0 : index
    %3 = vector.load %arg2[%c0_2, %c0_3] : memref<8x3xf32, #tpu.memory_space<vmem>>, vector<8x3xf32>
    %c32_i32 = arith.constant 32 : i32
    %4 = vector.broadcast %c32_i32 : i32 to vector<1x640xi32>
    %5 = arith.cmpi sge, %2, %4 : vector<1x640xi32>
    %c32_i32_4 = arith.constant 32 : i32
    %6 = tpu.dynamic_rotate %1 by %c32_i32_4 dim 1 : vector<8x640xf32>, i32 -> vector<8x640xf32>
    %cst = arith.constant 0.000000e+00 : f32
    %7 = vector.shape_cast %5 : vector<1x640xi1> to vector<1x640xi1>
    %8 = vector.broadcast %7 : vector<1x640xi1> to vector<8x640xi1>
    %9 = vector.broadcast %cst : f32 to vector<8x640xf32>
    %10 = arith.select %8, %6, %9 : vector<8x640xi1>, vector<8x640xf32>
    %c608_i32 = arith.constant 608 : i32
    %11 = vector.broadcast %c608_i32 : i32 to vector<1x640xi32>
    %12 = arith.cmpi slt, %2, %11 : vector<1x640xi32>
    %c608_i32_5 = arith.constant 608 : i32
    %13 = tpu.dynamic_rotate %1 by %c608_i32_5 dim 1 : vector<8x640xf32>, i32 -> vector<8x640xf32>
    %cst_6 = arith.constant 0.000000e+00 : f32
    %14 = vector.shape_cast %12 : vector<1x640xi1> to vector<1x640xi1>
    %15 = vector.broadcast %14 : vector<1x640xi1> to vector<8x640xi1>
    %16 = vector.broadcast %cst_6 : f32 to vector<8x640xf32>
    %17 = arith.select %15, %13, %16 : vector<8x640xi1>, vector<8x640xf32>
    %18 = vector.extract_strided_slice %3 {offsets = [0, 0], sizes = [8, 1], strides = [1, 1]} : vector<8x3xf32> to vector<8x1xf32>
    %19 = vector.broadcast %18 : vector<8x1xf32> to vector<8x640xf32>
    %20 = arith.mulf %19, %10 : vector<8x640xf32>
    %21 = vector.extract_strided_slice %3 {offsets = [0, 1], sizes = [8, 1], strides = [1, 1]} : vector<8x3xf32> to vector<8x1xf32>
    %22 = vector.broadcast %21 : vector<8x1xf32> to vector<8x640xf32>
    %23 = arith.mulf %22, %1 : vector<8x640xf32>
    %24 = arith.addf %20, %23 : vector<8x640xf32>
    %25 = vector.extract_strided_slice %3 {offsets = [0, 2], sizes = [8, 1], strides = [1, 1]} : vector<8x3xf32> to vector<8x1xf32>
    %26 = vector.broadcast %25 : vector<8x1xf32> to vector<8x640xf32>
    %27 = arith.mulf %26, %17 : vector<8x640xf32>
    %28 = arith.addf %24, %27 : vector<8x640xf32>
    %c0_7 = arith.constant 0 : index
    %c0_8 = arith.constant 0 : index
    %29 = vector.load %arg3[%c0_7, %c0_8] : memref<8x640xf32, #tpu.memory_space<vmem>>, vector<8x640xf32>
    %30 = arith.mulf %28, %29 : vector<8x640xf32>
    %c0_9 = arith.constant 0 : index
    %c0_10 = arith.constant 0 : index
    %31 = vector.load %arg4[%c0_9, %c0_10] : memref<8x640xf32, #tpu.memory_space<vmem>>, vector<8x640xf32>
    %32 = arith.addf %30, %31 : vector<8x640xf32>
    %33 = tpu.iota {dimensions = array<i32: 0>} : vector<32x640xi32>
    %c0_11 = arith.constant 0 : index
    %c0_12 = arith.constant 0 : index
    %34 = vector.load %arg5[%c0_11, %c0_12] : memref<1x640xi32, #tpu.memory_space<vmem>>, vector<1x640xi32>
    %35 = vector.broadcast %34 : vector<1x640xi32> to vector<32x640xi32>
    %36 = arith.cmpi eq, %35, %33 : vector<32x640xi32>
    %37 = arith.extui %36 : vector<32x640xi1> to vector<32x640xi32>
    %38 = arith.sitofp %37 : vector<32x640xi32> to vector<32x640xf32>
    %cst_13 = arith.constant dense<0.000000e+00> : vector<8x32xf32>
    %39 = tpu.matmul %32, %38, %cst_13 {dimension_numbers = #tpu.dot_dimension_numbers<[1], [1], [0], [0], [0, 0, 1, 0], [], []>} : vector<8x640xf32>, vector<32x640xf32>, vector<8x32xf32> -> vector<8x32xf32>
    %c0_14 = arith.constant 0 : index
    %c0_15 = arith.constant 0 : index
    %40 = vector.load %arg6[%c0_14, %c0_15] : memref<8x3xf32, #tpu.memory_space<vmem>>, vector<8x3xf32>
    %cst_16 = arith.constant 0.000000e+00 : f32
    %41 = vector.broadcast %cst_16 : f32 to vector<8x2xf32>
    %42 = vector.extract_strided_slice %39 {offsets = [0, 0], sizes = [8, 30], strides = [1, 1]} : vector<8x32xf32> to vector<8x30xf32>
    %43 = tpu.concatenate %41, %42 in 1 : vector<8x2xf32>, vector<8x30xf32> -> vector<8x32xf32>
    %44 = vector.extract_strided_slice %39 {offsets = [0, 2], sizes = [8, 30], strides = [1, 1]} : vector<8x32xf32> to vector<8x30xf32>
    %45 = tpu.concatenate %44, %41 in 1 : vector<8x30xf32>, vector<8x2xf32> -> vector<8x32xf32>
    %46 = vector.extract_strided_slice %40 {offsets = [0, 0], sizes = [8, 1], strides = [1, 1]} : vector<8x3xf32> to vector<8x1xf32>
    %47 = vector.broadcast %46 : vector<8x1xf32> to vector<8x32xf32>
    %48 = arith.mulf %47, %43 : vector<8x32xf32>
    %49 = vector.extract_strided_slice %40 {offsets = [0, 1], sizes = [8, 1], strides = [1, 1]} : vector<8x3xf32> to vector<8x1xf32>
    %50 = vector.broadcast %49 : vector<8x1xf32> to vector<8x32xf32>
    %51 = arith.mulf %50, %39 : vector<8x32xf32>
    %52 = arith.addf %48, %51 : vector<8x32xf32>
    %53 = vector.extract_strided_slice %40 {offsets = [0, 2], sizes = [8, 1], strides = [1, 1]} : vector<8x3xf32> to vector<8x1xf32>
    %54 = vector.broadcast %53 : vector<8x1xf32> to vector<8x32xf32>
    %55 = arith.mulf %54, %45 : vector<8x32xf32>
    %56 = arith.addf %52, %55 : vector<8x32xf32>
    %c0_17 = arith.constant 0 : index
    %c0_18 = arith.constant 0 : index
    %57 = vector.load %arg7[%c0_17, %c0_18] : memref<8x1xf32, #tpu.memory_space<vmem>>, vector<8x1xf32>
    %58 = vector.broadcast %57 : vector<8x1xf32> to vector<8x32xf32>
    %59 = arith.addf %56, %58 : vector<8x32xf32>
    %cst_19 = arith.constant 0.000000e+00 : f32
    %60 = vector.broadcast %cst_19 : f32 to vector<8x32xf32>
    %61 = arith.subf %60, %59 : vector<8x32xf32>
    %62 = math.exp %61 : vector<8x32xf32>
    %cst_20 = arith.constant 1.000000e+00 : f32
    %63 = vector.broadcast %cst_20 : f32 to vector<8x32xf32>
    %64 = arith.addf %63, %62 : vector<8x32xf32>
    %65 = tpu.reciprocal %64 : vector<8x32xf32> -> vector<8x32xf32>
    %66 = arith.mulf %59, %65 : vector<8x32xf32>
    %c0_21 = arith.constant 0 : index
    %c0_22 = arith.constant 0 : index
    %67 = vector.load %arg8[%c0_21, %c0_22] : memref<8x8xf32, #tpu.memory_space<vmem>>, vector<8x8xf32>
    %cst_23 = arith.constant dense<0.000000e+00> : vector<8x32xf32>
    %68 = tpu.matmul %67, %66, %cst_23 {dimension_numbers = #tpu.dot_dimension_numbers<[1], [0], [0], [1], [0, 0, 1, 1], [], []>} : vector<8x8xf32>, vector<8x32xf32>, vector<8x32xf32> -> vector<8x32xf32>
    %cst_24 = arith.constant dense<0.000000e+00> : vector<8x640xf32>
    %69 = tpu.matmul %68, %38, %cst_24 {dimension_numbers = #tpu.dot_dimension_numbers<[1], [0], [0], [1], [0, 0, 1, 1], [], []>} : vector<8x32xf32>, vector<32x640xf32>, vector<8x640xf32> -> vector<8x640xf32>
    %70 = arith.addf %69, %32 : vector<8x640xf32>
    %71 = arith.addf %70, %1 : vector<8x640xf32>
    %cst_25 = arith.constant 0.000000e+00 : f32
    %72 = vector.broadcast %cst_25 : f32 to vector<8x640xf32>
    %73 = arith.maximumf %71, %72 : vector<8x640xf32>
    %c0_26 = arith.constant 0 : index
    %c0_27 = arith.constant 0 : index
    %c0_28 = arith.constant 0 : index
    %74 = vector.load %arg9[%c0_26, %c0_27, %c0_28] : memref<1x8x640xf32, #tpu.memory_space<vmem>>, vector<1x8x640xf32>
    %75 = vector.shape_cast %74 : vector<1x8x640xf32> to vector<8x640xf32>
    %76 = vector.shape_cast %73 : vector<8x640xf32> to vector<1x8x640xf32>
    tpu.vector_store %arg9[%c0_26, %c0_27, %c0_28], %76 {strides = array<i32>} : memref<1x8x640xf32, #tpu.memory_space<vmem>>, vector<1x8x640xf32>,
    return
  }
  func.func @transform_0(%arg0: i32) -> (i32, i32, i32) {
    %c0_i32 = arith.constant 0 : i32
    %c0_i32_0 = arith.constant 0 : i32
    %c0_i32_1 = arith.constant 0 : i32
    return %arg0, %c0_i32, %c0_i32_0 : i32, i32, i32
  }
  func.func @transform_1(%arg0: i32) -> (i32, i32) {
    %c0_i32 = arith.constant 0 : i32
    %c0_i32_0 = arith.constant 0 : i32
    %c0_i32_1 = arith.constant 0 : i32
    return %c0_i32, %c0_i32_0 : i32, i32
  }
  func.func @transform_2(%arg0: i32) -> (i32, i32) {
    %c0_i32 = arith.constant 0 : i32
    %c0_i32_0 = arith.constant 0 : i32
    %c0_i32_1 = arith.constant 0 : i32
    return %c0_i32, %c0_i32_0 : i32, i32
  }
  func.func @transform_3(%arg0: i32) -> (i32, i32) {
    %c0_i32 = arith.constant 0 : i32
    %c0_i32_0 = arith.constant 0 : i32
    %c0_i32_1 = arith.constant 0 : i32
    return %c0_i32, %c0_i32_0 : i32, i32
  }
  func.func @transform_4(%arg0: i32) -> (i32, i32) {
    %c0_i32 = arith.constant 0 : i32
    %c0_i32_0 = arith.constant 0 : i32
    %c0_i32_1 = arith.constant 0 : i32
    return %c0_i32, %c0_i32_0 : i32, i32
  }
  func.func @transform_5(%arg0: i32) -> (i32, i32) {
    %c0_i32 = arith.constant 0 : i32
    %c0_i32_0 = arith.constant 0 : i32
    %c0_i32_1 = arith.constant 0 : i32
    return %c0_i32, %c0_i32_0 : i32, i32
  }
  func.func @transform_6(%arg0: i32) -> (i32, i32) {
    %c0_i32 = arith.constant 0 : i32
    %c0_i32_0 = arith.constant 0 : i32
    %c0_i32_1 = arith.constant 0 : i32
    return %c0_i32, %c0_i32_0 : i32, i32
  }
  func.func @transform_7(%arg0: i32) -> (i32, i32) {
    %c0_i32 = arith.constant 0 : i32
    %c0_i32_0 = arith.constant 0 : i32
    %c0_i32_1 = arith.constant 0 : i32
    return %c0_i32, %c0_i32_0 : i32, i32
  }
  func.func @transform_8(%arg0: i32) -> (i32, i32, i32) {
    %c0_i32 = arith.constant 0 : i32
    %c0_i32_0 = arith.constant 0 : i32
    %c0_i32_1 = arith.constant 0 : i32
    return %arg0, %c0_i32, %c0_i32_0 : i32, i32, i32
  }
}

</mosaic_0001>

<bundles_post_ra>
// kernel: bcres_block.1
= control target key start
LH: loop header
LB: loop body
LE: loop exit
PB: predicated region body
PF: predicated region fallthrough
CT: control target
= control target key end

     0   :  { %s1351_s27 = smov 0   ;;  %s1758_s0 = inlined_call_operand.vmem [shape: f32[2,8,640], index: 0, kind: input, shape index: {}]   ;;  %s1759_s1 = inlined_call_operand.vmem [shape: f32[8,3], index: 1, kind: input, shape index: {}]   ;;  %s1760_s2 = inlined_call_operand.vmem [shape: f32[8,640], index: 2, kind: input, shape index: {}]   ;;  %s1761_s3 = inlined_call_operand.vmem [shape: f32[8,640], index: 3, kind: input, shape index: {}]   ;;  %s1762_s4 = inlined_call_operand.vmem [shape: s32[1,640], index: 4, kind: input, shape index: {}]   ;;  %s1763_s5 = inlined_call_operand.vmem [shape: f32[8,3], index: 5, kind: input, shape index: {}]   ;;  %s1764_s6 = inlined_call_operand.vmem [shape: f32[8,1], index: 6, kind: input, shape index: {}]   ;;  %s1765_s7 = inlined_call_operand.vmem [shape: f32[8,8], index: 7, kind: input, shape index: {}]   ;;  %s1766_s8 = inlined_call_operand.vmem [shape: f32[2,8,640], index: 8, kind: output, shape index: {}]  }
   0x1 LB: > { %s1148_s28 = sadd.s32 4294967295, %s1294_s27   ;;  %p1152_p0 = scmp.ge.s32.totalorder %s1294_s27, 1  ;;  %s1294_s27 = sphi %s1351_s27, %s18_s27  }
   0x2   : > { %p262_p1 = scmp.lt.s32.totalorder %s1294_s27, 3 }
   0x4   : > { %p263_p2 = pnand %p1152_p0, %p262_p1 }
   0x5   : > { %p296_p3 = scmp.lt.s32.totalorder (!%p263_p2), %s1148_s28, 1  ;;  %s1299_s15 = smov (!%p263_p2), 32  }
   0x6   : > { %266 = sbr.rel (%p263_p2) target bundleno = 943 (0x3af), region = 52  ;;  %s1301_s16 = smov (!%p263_p2), 96  }
   0x7   : > { %s1304_s20 = smov (!%p263_p2), 126   ;;  %s1305_s21 = smov (!%p263_p2), 2  }
   0xb   : > { %v317_v0 = vld [vmem:[%s1759_s1] sm:$0xff]  ;;  %v311_v1 = vlaneseq  ;;  %v1296_v2 = vmov 2   ;;  %v1297_v3 = vmov 1   ;;  %s1782_s28 = smov (!%p296_p3, %s1148_s28), 1  ;;  %v1298_v9 = vmov 0   ;;  %v429_v48 = vld [vmem:[%s1760_s2 + $0x8] sm:$0xff] }
   0xc   : > { %1281 = vset.pattern.permute.xlu1 %v1296_v2  ;;  %1279 = vset.pattern.permute.xlu0 %v1297_v3  ;;  %v453_v5 = vld [vmem:[%s1762_s4] sm:$0x1f]  ;;  %s1260_s11 = smul.u32 40, %s1782_s28  ;;  %v1300_v16 = vmov 1.0   ;;  %v1302_v26 = vmov 0.0   ;;  %v439_v55 = vld [vmem:[%s1761_s3 + $0x8] sm:$0xff] }
   0xd   : > { %415 = vperm.xlu1 %1281, %v317_v0   ;;  %401 = vperm.xlu0 %1279, %v317_v0   ;;  %v1366_v4 = vshrl.u32 %v311_v1, 7  ;;  %v744_v27 = vld [vmem:[%s1763_s5] sm:$0xff]  ;;  %v312_v30 = vand.u32 127, %v311_v1 }
   0xe   : > { %s1382_s14 = scalar_lea.vmem %s1758_s0, %s1260_s11  ;;  %v428_v59 = vld [vmem:[%s1760_s2] sm:$0xff]  ;;  %s305_s30 = scalar_lea.vmem %s1766_s8, %s1260_s11 }
   0xf   : > { %v1373_v6 = vadd.s32 24, %v1366_v4  ;;  %v460_v7 = vsub.s32 1, %v1366_v4  ;;  %v456_v8 = vsub.s32 0, %v1366_v4  ;;  %v1389_v12 = vld [vmem:[%s1382_s14] sm:$0xff]  ;;  %v1392_v13 = vadd.s32 16, %v1366_v4  ;;  %v1404_v15 = vld [vmem:[%s1382_s14 + $0x8] sm:$0xff] }
  0x10   : > { %v1395_v14 = vld [vmem:[%s1382_s14 + $0x20] sm:$0xff]  ;;  %v1425_v17 = vadd.s32 8, %v1366_v4  ;;  %v468_v18 = vsub.s32 3, %v1366_v4  ;;  %v1429_v19 = vld [vmem:[%s1382_s14 + $0x10] sm:$0xff]  ;;  %v464_v20 = vsub.s32 2, %v1366_v4  ;;  %v472_v23 = vsub.s32 4, %v1366_v4 }
  0x11   : > { %1280 = vset.pattern.permute.xlu0 %v1298_v9  ;;  %v1384_v10 = vrot.slane %v453_v5, %v460_v7  ;;  %v1386_v11 = vrot.slane %v453_v5, %v456_v8  ;;  %1282 = vset.pattern.permute.xlu1 %v1297_v3  ;;  %v1484_v24 = vld [vmem:[%s1382_s14 + $0x18] sm:$0xff]  ;;  %v316_v58 = vadd.s32 512, %v312_v30 }
  0x12   : > { %392 = vperm.xlu0 %1280, %v317_v0   ;;  %323 = vrot.lane.b32.xlu1 %v1389_v12, %s1299_s15  ;;  %v1436_v21 = vrot.slane %v453_v5, %v468_v18  ;;  %v1442_v22 = vrot.slane %v453_v5, %v464_v20  ;;  %v1494_v25 = vrot.slane %v453_v5, %v472_v23 }
  0x13   : > { %vm490_vm0 = vcmp.eq.s32.totalorder %v1384_v10, %v1373_v6  ;;  %vm489_vm1 = vcmp.eq.s32.totalorder %v1386_v11, %v1373_v6  ;;  %vm485_vm2 = vcmp.eq.s32.totalorder %v1384_v10, %v1392_v13  ;;  %vm484_vm3 = vcmp.eq.s32.totalorder %v1386_v11, %v1392_v13 }
  0x14   : > { %1175 = vmatprep.subr.msk.mxu0 %vm490_vm0, %v1300_v16  ;;  %vm480_vm4 = vcmp.eq.s32.totalorder %v1384_v10, %v1425_v17  ;;  %vm479_vm5 = vcmp.eq.s32.totalorder %v1386_v11, %v1425_v17  ;;  %vm492_vm6 = vcmp.eq.s32.totalorder %v1436_v21, %v1373_v6  ;;  %vm1773_vm7 = vcmp.eq.s32.totalorder %v1442_v22, %v1373_v6 }
  0x15   : > { %1176 = vmatpush1.xpose.msk.msra.mxu0 %vm489_vm1, %v1300_v16  ;;  %1183 = vmatprep.subr.msk.mxu1 %vm492_vm6, %v1300_v16  ;;  %vm475_vm8 = vcmp.eq.s32.totalorder %v1384_v10, %v1366_v4  ;;  %vm474_vm9 = vcmp.eq.s32.totalorder %v1386_v11, %v1366_v4  ;;  %vm1770_vm10 = vcmp.eq.s32.totalorder %v1436_v21, %v1392_v13 }
  0x16   : > { %331 = vrot.lane.b32.xlu0 %v1395_v14, %s1299_s15  ;;  %1177 = vmatprep.subr.msk.mxu0 %vm485_vm2, %v1300_v16  ;;  %vm1767_vm11 = vcmp.eq.s32.totalorder %v1442_v22, %v1392_v13  ;;  %vm493_vm12 = vcmp.eq.s32.totalorder %v1494_v25, %v1373_v6  ;;  %vm1768_vm13 = vcmp.eq.s32.totalorder %v1436_v21, %v1425_v17 }
  0x17   : > { %325 = vrot.lane.b32.xlu1 %v1404_v15, %s1299_s15  ;;  %1184 = vmatpush1.xpose.msk.msra.mxu1 %vm1773_vm7, %v1300_v16  ;;  %vm1769_vm14 = vcmp.eq.s32.totalorder %v1442_v22, %v1425_v17  ;;  %vm488_vm15 = vcmp.eq.s32.totalorder %v1494_v25, %v1392_v13  ;;  %vm369_vm7 = vcmp.lt.s32.totalorder %v312_v30, 96 }
  0x18   : > { %1185 = vmatprep.subr.msk.mxu1 %vm1770_vm10, %v1300_v16  ;;  %vm478_vm10 = vcmp.eq.s32.totalorder %v1494_v25, %v1366_v4 }
  0x19   : > { %1178 = vmatpush1.xpose.msk.msra.mxu0 %vm484_vm3, %v1300_v16 }
  0x1a   : > { %363 = vrot.lane.b32.xlu0 %v1429_v19, %s1301_s16  ;;  %1179 = vmatprep.subr.msk.mxu0 %vm480_vm4, %v1300_v16 }
  0x1b   : > { %361 = vrot.lane.b32.xlu1 %v1404_v15, %s1301_s16  ;;  %1186 = vmatpush1.xpose.msk.msra.mxu1 %vm1767_vm11, %v1300_v16  ;;  %vm1772_vm11 = vcmp.eq.s32.totalorder %v1436_v21, %v1366_v4 }
  0x1c   : > { %1187 = vmatprep.subr.msk.mxu1 %vm1768_vm13, %v1300_v16  ;;  %vm1771_vm13 = vcmp.eq.s32.totalorder %v1442_v22, %v1366_v4 }
  0x1d   : > { %1180 = vmatpush1.xpose.msk.msra.mxu0 %vm479_vm5, %v1300_v16 }
  0x1e   : > { %327 = vrot.lane.b32.xlu0 %v1429_v19, %s1299_s15  ;;  %1181 = vmatprep.subr.msk.mxu0 %vm475_vm8, %v1300_v16 }
  0x1f   : > { %359 = vrot.lane.b32.xlu1 %v1389_v12, %s1301_s16  ;;  %1188 = vmatpush1.xpose.msk.msra.mxu1 %vm1769_vm14, %v1300_v16  ;;  %vm483_vm14 = vcmp.eq.s32.totalorder %v1494_v25, %v1425_v17 }
  0x20   : > { %1189 = vmatprep.subr.msk.mxu1 %vm1772_vm11, %v1300_v16  ;;  %vm318_vm11 = vcmp.ge.s32.totalorder %v312_v30, 32 }
  0x21   : > { %1182 = vmatpush1.xpose.msk.msra.mxu0 %vm474_vm9, %v1300_v16 }
  0x22   : > { %365 = vrot.lane.b32.xlu0 %v1484_v24, %s1301_s16  ;;  %1233 = vmatprep.subr.mxu0 %v1302_v26 }
  0x23   : > { %329 = vrot.lane.b32.xlu1 %v1484_v24, %s1299_s15  ;;  %1190 = vmatpush1.xpose.msk.msra.mxu1 %vm1771_vm13, %v1300_v16  ;;  %vm333_vm13 = vcmp.lt.s32.totalorder %v312_v30, 32  ;;  %v431_v30 = vld [vmem:[%s1760_s2 + $0x18] sm:$0xff] }
  0x24   : > { %1244 = vmatprep.subr.mxu1 %v1302_v26 }
  0x26   : > { %758 = vperm.xlu0 %1280, %v744_v27  }
  0x27   : > { %367 = vrot.lane.b32.xlu1 %v1395_v14, %s1301_s16 }
  0x2b   : > { %763 = vperm.xlu1 %1282, %v744_v27  }
  0x2f   : > { %1283 = vset.pattern.permute.xlu1 %v1296_v2  ;;  %v438_v2 = vld [vmem:[%s1761_s3] sm:$0xff] }
  0x30   : > { %769 = vperm.xlu1 %1283, %v744_v27  }
  0x88   : > { %v1548_v28 = vpop.permute.xlu1 %415  ;;  %v1550_v29 = vpop.permute.xlu0 %401 }
  0x89   : > { %v405_v40 = vmul.f32 %v1550_v29, %v1404_v15  ;;  %v404_v46 = vmul.f32 %v1550_v29, %v1389_v12  ;;  %v406_v62 = vmul.f32 %v1550_v29, %v1429_v19  ;;  %v407_v20 = vmul.f32 %v1550_v29, %v1484_v24 }
  0x8c   : > { %v324_v31 = vpop.permute.xlu1 %323 }
  0x8d   : > { %v393_v32 = vpop.permute.xlu0 %392 }
  0x90   : > { %v326_v33 = vpop.permute.xlu1 %325 }
  0x91   : > { %v337_v34 = vsel %vm333_vm13, %v324_v31, %v326_v33  ;;  %v332_v35 = vpop.permute.xlu0 %331 }
  0x92   : > { %v338_v36 = vsel %vm333_vm13, %v332_v35, %v324_v31  ;;  %v396_v37 = vmul.f32 %v393_v32, %v337_v34 }
  0x93   : > { %v349_v38 = vsel %vm318_vm11, %v338_v36, 0.0  ;;  %vm358_vm11 = vcmp.lt.s32.totalorder %v316_v58, 608 }
  0x94   : > { %v362_v39 = vpop.permute.xlu1 %361  ;;  %v395_v42 = vmul.f32 %v393_v32, %v349_v38  ;;  %v410_v44 = vadd.f32 %v405_v40, %v396_v37 }
  0x95   : > { %v364_v41 = vpop.permute.xlu0 %363 }
  0x96   : > { %v372_v43 = vsel %vm369_vm7, %v362_v39, %v364_v41  ;;  %v409_v52 = vadd.f32 %v404_v46, %v395_v42  ;;  %v441_v42 = vld [vmem:[%s1761_s3 + $0x18] sm:$0xff]  ;;  %v440_v46 = vld [vmem:[%s1761_s3 + $0x10] sm:$0xff] }
  0x97   : > { %v419_v45 = vmul.f32 %v1548_v28, %v372_v43 }
  0x98   : > { %v360_v47 = vpop.permute.xlu1 %359 }
  0x99   : > { %v424_v49 = vadd.f32 %v419_v45, %v410_v44  ;;  %v373_v50 = vsel %vm369_vm7, %v360_v47, %v362_v39  ;;  %v328_v51 = vpop.permute.xlu0 %327  ;;  %v430_v39 = vld [vmem:[%s1760_s2 + $0x10] sm:$0xff] }
  0x9a   : > { %v418_v53 = vmul.f32 %v1548_v28, %v373_v50  ;;  %v336_v54 = vsel %vm333_vm13, %v326_v33, %v328_v51  ;;  %v442_v50 = vld [vmem:[%s1761_s3 + $0x20] sm:$0xff] }
  0x9b   : > { %v397_v56 = vmul.f32 %v393_v32, %v336_v54  ;;  %v434_v57 = vmul.f32 %v429_v48, %v424_v49 }
  0x9c   : > { %v423_v60 = vadd.f32 %v418_v53, %v409_v52  ;;  %v330_v61 = vpop.permute.xlu1 %329 }
  0x9d   : > { %v335_v63 = vsel %vm333_vm13, %v328_v51, %v330_v61  ;;  %v366_v0 = vpop.permute.xlu0 %365  ;;  %v1576_v1 = vadd.f32 %v439_v55, %v434_v57  ;;  %v411_v8 = vadd.f32 %v406_v62, %v397_v56  ;;  %v334_v9 = vsel %vm333_vm13, %v330_v61, %v332_v35 }
  0x9e   : > { %v398_v3 = vmul.f32 %v393_v32, %v335_v63  ;;  %v371_v5 = vsel %vm369_vm7, %v364_v41, %v366_v0  ;;  %v433_v7 = vmul.f32 %v428_v59, %v423_v60  ;;  %v399_v36 = vmul.f32 %v393_v32, %v334_v9  ;;  %v774_v60 = vld [vmem:[%s1764_s6] sm:$0xff] }
  0x9f   : > { %v420_v18 = vmul.f32 %v1548_v28, %v371_v5  ;;  %598 = vmatprep.mubr.f32.mxu0 %v1576_v1  ;;  %v408_v32 = vmul.f32 %v1550_v29, %v1395_v14  ;;  %vm788_vm13 = vcmask 64512  }
  0xa0   : > { %v368_v23 = vpop.permute.xlu1 %367  ;;  %v1587_v27 = vadd.f32 %v438_v2, %v433_v7  ;;  %v412_v37 = vadd.f32 %v407_v20, %v398_v3 }
  0xa1   : > { %v425_v31 = vadd.f32 %v420_v18, %v411_v8  ;;  %v370_v33 = vsel %vm369_vm7, %v366_v0, %v368_v23  ;;  %v374_v34 = vsel %vm369_vm7, %v368_v23, %v360_v47  ;;  %vm1303_vm7 = vmmov 0   ;;  %v432_v47 = vld [vmem:[%s1760_s2 + $0x20] sm:$0xff]  ;;  %v759_v25 = vpop.permute.xlu0 %758 }
  0xa2   : > { %v389_v38 = vsel %vm358_vm11, %v374_v34, 0.0  ;;  %v421_v35 = vmul.f32 %v1548_v28, %v370_v33  ;;  %599 = vmatmul.mubr.f32.vlgmr.msra.gmra.mxu0 %v1587_v27  ;;  %v413_v44 = vadd.f32 %v408_v32, %v399_v36 }
  0xa3   : > { %1234 = vmatpush3.xpose.msk.msra.mxu0 %vm493_vm12, %v1300_v16  ;;  %1241 = vmatprep.mubr.msk.f32.mxu0 %vm1303_vm7, %v1302_v26  ;;  %v422_v40 = vmul.f32 %v1548_v28, %v389_v38  ;;  %v435_v43 = vmul.f32 %v430_v39, %v425_v31 }
  0xa4   : > { %v426_v41 = vadd.f32 %v421_v35, %v412_v37  ;;  %1235 = vmatprep.subr.mxu0 %v1302_v26  ;;  %v787_v35 = vld [vmem:[%s1765_s7] sm:$0xff] }
  0xa5   : > { %v427_v28 = vadd.f32 %v422_v40, %v413_v44  ;;  %v1625_v48 = vadd.f32 %v440_v46, %v435_v43 }
  0xa6   : > { %v436_v45 = vmul.f32 %v431_v30, %v426_v41  ;;  %v764_v61 = vpop.permute.xlu1 %763 }
  0xa7   : > { %1236 = vmatpush3.xpose.msk.msra.mxu0 %vm488_vm15, %v1300_v16  ;;  %v437_v49 = vmul.f32 %v432_v47, %v427_v28 }
  0xa8   : > { %1237 = vmatprep.subr.mxu0 %v1302_v26  ;;  %v1620_v29 = vadd.f32 %v441_v42, %v436_v45 }
  0xa9   : > { %v1643_v51 = vadd.f32 %v442_v50, %v437_v49 }
  0xaa   : > { %668 = vmatprep.mubr.f32.mxu1 %v1620_v29 }
  0xab   : > { %1238 = vmatpush3.xpose.msk.msra.mxu0 %vm483_vm14, %v1300_v16  ;;  %669 = vmatmul.mubr.f32.vlgmr.msra.gmra.mxu1 %v1625_v48  ;;  %v770_v62 = vpop.permute.xlu1 %769 }
  0xac   : > { %1239 = vmatprep.subr.mxu0 %v1302_v26  ;;  %1246 = vmatprep.mubr.msk.f32.mxu1 %vm1303_vm7, %v1302_v26 }
  0xaf   : > { %1240 = vmatpush3.xpose.msk.msra.mxu0 %vm478_vm10, %v1300_v16 }
  0xb0   : > { %1249 = vmatprep.subr.mxu0 %v1302_v26 }
  0xb2   : > { %1242 = vmatmul.mubr.f32.vlgmr.msra.gmra.mxu0 %v1643_v51 }
  0xb3   : > { %1250 = vmatpush3.msk.msra.mxu0 %vm493_vm12, %v1300_v16  ;;  %1257 = vmatprep.mubr.msk.f32.mxu0 %vm1303_vm7, %v1302_v26  ;;  %vm754_vm12 = vcmask 244736  }
  0xb4   : > { %1251 = vmatprep.subr.mxu0 %v1302_v26 }
  0xb5   : > { %1252 = vmatpush3.msk.msra.mxu0 %vm488_vm15, %v1300_v16 }
  0xb6   : > { %1253 = vmatprep.subr.mxu0 %v1302_v26 }
  0xb7   : > { %1254 = vmatpush3.msk.msra.mxu0 %vm483_vm14, %v1300_v16 }
  0xb8   : > { %1255 = vmatprep.subr.mxu0 %v1302_v26 }
  0xb9   : > { %1256 = vmatpush3.msk.msra.mxu0 %vm478_vm10, %v1300_v16  ;;  %vm749_vm10 = vcmask 15360  }
 0x162   : > { %v600_v52 = vpop.f32.mrf.mxu0 }
 0x164   : > { %v602_v53 = vpop.f32.mrf.mxu0 }
 0x16b   : > { %v670_v54 = vpop.f32.mrf.mxu1 }
 0x16c   : > { %v671_v56 = vadd.f32 %v670_v54, %v600_v52 }
 0x16d   : > { %v672_v55 = vpop.f32.mrf.mxu1 }
 0x172   : > { %v740_v57 = vpop.f32.mrf.mxu0 }
 0x173   : > { %v741_v58 = vadd.f32 %v740_v57, %v671_v56 }
 0x174   : > { %v1243_v59 = vpop.f32.mrf.mxu0 }
 0x175   : > { %751 = vrot.lane.b32.xlu1 %v741_v58, %s1304_s20  ;;  %746 = vrot.lane.b32.xlu0 %v741_v58, %s1305_s21  ;;  %v766_v5 = vmul.f32 %v764_v61, %v741_v58 }
 0x179   : > { %777 = vperm.xlu0 %1280, %v774_v60  }
 0x1e7   : > { %v747_v63 = vpop.permute.xlu0 %746  ;;  %v752_v2 = vpop.permute.xlu1 %751 }
 0x1e8   : > { %v750_v0 = vsel %vm749_vm10, 0.0, %v747_v63  ;;  %v755_v7 = vsel %vm754_vm12, %v752_v2, 0.0 }
 0x1e9   : > { %v761_v3 = vmul.f32 %v759_v25, %v750_v0  ;;  %v772_v9 = vmul.f32 %v770_v62, %v755_v7 }
 0x1eb   : > { %v767_v8 = vadd.f32 %v766_v5, %v761_v3 }
 0x1ed   : > { %v773_v18 = vadd.f32 %v772_v9, %v767_v8 }
 0x1f4   : > { %v778_v20 = vpop.permute.xlu0 %777 }
 0x1f5   : > { %v780_v23 = vadd.f32 %v778_v20, %v773_v18 }
 0x1f7   : > { %v781_v31 = vsub.f32 0.0, %v780_v23 }
 0x1f9   : > { %v782_v33 = vmul.f32 1.442695, %v781_v31 }
 0x1fb   : > { %1284 = vpow2.f32 %v782_v33 }
 0x208   : > { %v1285_v34 = vpop.eup %1284 }
 0x209   : > { %v784_v36 = vadd.f32 1.0, %v1285_v34 }
 0x20b   : > { %1286 = vrcp.f32 %v784_v36 }
 0x218   : > { %v1287_v37 = vpop.eup %1286 }
 0x219   : > { %v786_v38 = vmul.f32 %v1287_v37, %v780_v23 }
 0x21b   : > { %1245 = vmatpush3.msra.mxu1 %v786_v38 }
 0x21c   : > { %1247 = vmatmul.mubr.msk.f32.vlgmr.msra.gmra.mxu1 %vm788_vm13, %v787_v35  ;;  %1196 = vmatprep.subr.msk.mxu1 %vm490_vm0, %v1300_v16  ;;  %vm862_vm0 = vcmask 261120  }
 0x21d   : > { %1197 = vmatpush1.msk.msra.mxu1 %vm489_vm1, %v1300_v16  ;;  %930 = vmatprep.mubr.f32.mxu1 %v1302_v26  ;;  %vm1774_vm1 = vcmp.eq.s32.totalorder %v1442_v22, %v1373_v6 }
 0x21e   : > { %1198 = vmatprep.subr.msk.mxu1 %vm485_vm2, %v1300_v16  ;;  %vm1775_vm2 = vcmp.eq.s32.totalorder %v1436_v21, %v1392_v13 }
 0x21f   : > { %1199 = vmatpush1.msk.msra.mxu1 %vm484_vm3, %v1300_v16  ;;  %vm1776_vm3 = vcmp.eq.s32.totalorder %v1442_v22, %v1392_v13 }
 0x220   : > { %1200 = vmatprep.subr.msk.mxu1 %vm480_vm4, %v1300_v16  ;;  %vm1777_vm4 = vcmp.eq.s32.totalorder %v1436_v21, %v1425_v17 }
 0x221   : > { %1201 = vmatpush1.msk.msra.mxu1 %vm479_vm5, %v1300_v16  ;;  %vm1778_vm5 = vcmp.eq.s32.totalorder %v1442_v22, %v1425_v17 }
 0x222   : > { %1202 = vmatprep.subr.msk.mxu1 %vm475_vm8, %v1300_v16  ;;  %vm1780_vm8 = vcmp.eq.s32.totalorder %v1442_v22, %v1366_v4 }
 0x223   : > { %1203 = vmatpush1.msk.msra.mxu1 %vm474_vm9, %v1300_v16 }
 0x224   : > { %1205 = vmatprep.subr.msk.mxu1 %vm492_vm6, %v1300_v16  ;;  %vm1779_vm6 = vcmp.eq.s32.totalorder %v1436_v21, %v1366_v4 }
 0x2dc   : > { %v858_v39 = vpop.f32.mrf.mxu1 }
 0x2dd   : > { %1204 = vmatmul.mubr.msk.f32.vlgmr.msra.gmra.mxu1 %vm862_vm0, %v858_v39  ;;  %1258 = vmatmul.mubr.msk.f32.vlgmr.msra.gmra.mxu0 %vm862_vm0, %v858_v39 }
 0x2de   : > { %1206 = vmatpush1.msk.msra.mxu1 %vm1774_vm1, %v1300_v16  ;;  %v1248_v10 = vpop.f32.mrf.mxu1  ;;  %1001 = vmatprep.mubr.f32.mxu1 %v1302_v26 }
 0x2df   : > { %1207 = vmatprep.subr.msk.mxu1 %vm1775_vm2, %v1300_v16 }
 0x2e0   : > { %1208 = vmatpush1.msk.msra.mxu1 %vm1776_vm3, %v1300_v16 }
 0x2e1   : > { %1209 = vmatprep.subr.msk.mxu1 %vm1777_vm4, %v1300_v16 }
 0x2e2   : > { %1210 = vmatpush1.msk.msra.mxu1 %vm1778_vm5, %v1300_v16 }
 0x2e3   : > { %1211 = vmatprep.subr.msk.mxu1 %vm1779_vm6, %v1300_v16 }
 0x2e4   : > { %1212 = vmatpush1.msk.msra.mxu1 %vm1780_vm8, %v1300_v16 }
 0x2e5   : > { %1213 = vmatmul.mubr.msk.f32.vlgmr.msra.gmra.mxu1 %vm862_vm0, %v858_v39 }
 0x39d   : > { %v932_v6 = vpop.f32.mrf.mxu1  ;;  %v1074_v11 = vpop.f32.mrf.mxu0 }
 0x39e   : > { %v933_v13 = vadd.f32 %v932_v6, %v1587_v27  ;;  %v1075_v26 = vadd.f32 %v1074_v11, %v1643_v51 }
 0x39f   : > { %v934_v30 = vpop.f32.mrf.mxu1  ;;  %v1259_v17 = vpop.f32.mrf.mxu0 }
 0x3a0   : > { %v1078_v32 = vadd.f32 %v933_v13, %v1389_v12  ;;  %v1082_v40 = vadd.f32 %v1075_v26, %v1395_v14  ;;  %v935_v21 = vadd.f32 %v934_v30, %v1576_v1 }
 0x3a2   : > { %v1083_v4 = vmax.f32 %v1078_v32, 0.0  ;;  %v1087_v16 = vmax.f32 %v1082_v40, 0.0  ;;  %v1079_v22 = vadd.f32 %v935_v21, %v1404_v15 }
 0x3a4   : > { %1088 = vst [vmem:[%s305_s30] sm:$0xff] %v1083_v4  ;;  %1092 = vst [vmem:[%s305_s30 + $0x20] sm:$0xff] %v1087_v16  ;;  %v1084_v27 = vmax.f32 %v1079_v22, 0.0 }
 0x3a5   : > { %v1003_v41 = vpop.f32.mrf.mxu1 }
 0x3a6   : > { %1089 = vst [vmem:[%s305_s30 + $0x8] sm:$0xff] %v1084_v27  ;;  %v1004_v12 = vadd.f32 %v1003_v41, %v1625_v48 }
 0x3a7   : > { %v1005_v42 = vpop.f32.mrf.mxu1 }
 0x3a8   : > { %v1080_v14 = vadd.f32 %v1004_v12, %v1429_v19  ;;  %v1006_v1 = vadd.f32 %v1005_v42, %v1620_v29 }
 0x3aa   : > { %v1085_v43 = vmax.f32 %v1080_v14, 0.0  ;;  %v1081_v44 = vadd.f32 %v1006_v1, %v1484_v24 }
 0x3ac   : > { %1090 = vst [vmem:[%s305_s30 + $0x10] sm:$0xff] %v1085_v43  ;;  %v1086_v45 = vmax.f32 %v1081_v44, 0.0 }
 0x3ae   : > { %1091 = vst [vmem:[%s305_s30 + $0x18] sm:$0xff] %v1086_v45 }
 0x3af PF: > { %s18_s27 = sadd.s32 1, %s1294_s27  }
 0x3b0   : > { %p15_p4 = scmp.ge.s32.totalorder %s18_s27, 4  }
 0x3b2   :  { %17 = sbr.rel (!%p15_p4) target bundleno = 1 (0x1), region = 82 }

</bundles_post_ra>
